<compile_context>
chip_gen: v7x
topology: tpu7x:2x2x1
jax: 0.10.0
libtpu: 0.0.40
codegen_flags: <defaults>
</compile_context>

<pallas_src>
import functools

import jax
import jax.numpy as jnp
from jax.experimental import pallas as pl
from jax.experimental.pallas import tpu as pltpu


def _round_up(x, m):
    return ((x + m - 1) // m) * m


def _spec(shape, index_map, buffers=None):
    """BlockSpec with an explicit pipeline buffer count (graceful fallback)."""
    if buffers is None:
        return pl.BlockSpec(shape, index_map)
    try:
        return pl.BlockSpec(shape, index_map, pipeline_mode=pl.Buffered(buffers))
    except TypeError:  # older jax without pipeline_mode: default double-buffer
        return pl.BlockSpec(shape, index_map)


def mapping_kernel(x_ref, att_ref, noise_ref,
                   wmu_ref, bmu_ref, wsg_ref, bsg_ref,
                   wde_ref, wda_ref, bdis_ref,
                   wcls_ref, bcls_ref,
                   mus_ref, stds_ref, dis_ref, pred_ref, enc_ref,
                   *, train_G):
    """One batch tile of the full Mapping forward pass.

    x_ref:     (TB, resSize)  bf16      att_ref: (TB, attSize)  f32
    noise_ref: (TB, L)        f32       (reparameterization noise)
    wmu/wsg:   (resSize, L)   bf16      bmu/bsg: (1, L) f32   (split encoder)
    wde:       (1, L) f32     wda: (1, attSize) f32    bdis: (1,1) f32 in SMEM
    wcls:      (L, nclass_p)  bf16      bcls: (1, nclass_p) f32 (pad = -1e30)
    outputs:   mus/stds/enc (TB, L), dis (TB, 1), pred (TB, nclass_p), all f32
    """
    x = x_ref[...]

    # Encoder (bf16 MXU, f32 accumulation); the weight is pre-split into mu /
    # sigma halves so no lane-offset slice of the activation is needed.
    zmu = jnp.dot(x, wmu_ref[...], preferred_element_type=jnp.float32) + bmu_ref[...]
    zsg = jnp.dot(x, wsg_ref[...], preferred_element_type=jnp.float32) + bsg_ref[...]
    mus = jnp.where(zmu > 0, zmu, 0.2 * zmu)          # LeakyReLU(0.2)
    lat = jnp.where(zsg > 0, zsg, 0.2 * zsg)
    stds = pl.reciprocal(1.0 + jnp.exp(-lat), approx=True)   # sigmoid via EUP
    enc_out = noise_ref[...] * stds + mus             # reparameterization

    # Discriminator on cat([enc_out | mus, att]) without materializing the
    # concat; the N=1 "matmul" is a VPU multiply + lane reduce, not MXU.
    dis_in = mus if train_G else enc_out
    dis = (jnp.sum(dis_in * wde_ref[...], axis=-1, keepdims=True)
           + jnp.sum(att_ref[...] * wda_ref[...], axis=-1, keepdims=True)
           + bdis_ref[0, 0])

    # Classifier (bf16 MXU, f32 acc) + log-softmax in f32. Padded columns have
    # bias -1e30 -> exp() == 0, so real classes are unaffected.
    logits = jnp.dot(mus.astype(wcls_ref.dtype), wcls_ref[...],
                     preferred_element_type=jnp.float32) + bcls_ref[...]
    m = jnp.max(logits, axis=-1, keepdims=True)
    s = logits - m
    pred = s - jnp.log(jnp.sum(jnp.exp(s), axis=-1, keepdims=True))

    mus_ref[...] = mus.astype(mus_ref.dtype)
    stds_ref[...] = stds.astype(stds_ref.dtype)
    dis_ref[...] = dis.astype(dis_ref.dtype)
    pred_ref[...] = pred.astype(pred_ref.dtype)
    enc_ref[...] = enc_out.astype(enc_ref.dtype)


def mapping_forward(x, att, noise, params, *, train_G=False, tb=512,
                    input_buffers=2):
    """x: (B, resSize), att: (B, attSize), noise: (B, latenSize) ->
    (mus, stds, dis_out, pred, encoder_out)."""
    w_enc, b_enc, w_dis_enc, w_dis_att, b_dis, w_cls, b_cls = params
    B, res = x.shape
    att_size = att.shape[1]
    L = w_enc.shape[1] // 2
    nclass = w_cls.shape[1]
    nclass_p = _round_up(nclass, 128)     # lane-dense pred stores, fuller MXU

    # Split encoder weight/bias into lane-aligned mu / sigma halves (bf16 MXU).
    w_mu = w_enc[:, :L].astype(jnp.bfloat16)
    w_sg = w_enc[:, L:].astype(jnp.bfloat16)
    b_mu = b_enc[:, :L]
    b_sg = b_enc[:, L:]

    # Pad classifier columns; padded logits get -1e30 so log-softmax over the
    # real classes is unchanged (exp(-1e30) == 0).
    w_cls_p = jnp.zeros((L, nclass_p), jnp.bfloat16).at[:, :nclass].set(
        w_cls.astype(jnp.bfloat16))
    b_cls_p = jnp.full((1, nclass_p), -1e30, jnp.float32).at[:, :nclass].set(b_cls)

    x_bf = x.astype(jnp.bfloat16)

    # ---- batch tile selection -------------------------------------------
    TB = min(tb, B)
    if B >= 32 and pl.cdiv(B, TB) < 2:
        # >=2 grid steps so the "parallel" batch axis can split across the
        # two TensorCores of a v7x chip.
        TB = min(TB, _round_up((B + 1) // 2, 16))

    # ---- VMEM budget (weights single-buffered, tiles multi-buffered) ------
    weight_bytes = (2 * res * L * 2            # w_mu + w_sg (bf16)
                    + L * nclass_p * 2         # w_cls (bf16)
                    + (2 * L + nclass_p) * 4   # biases (f32)
                    + (L + att_size) * 4)      # discriminator rows (f32)

    def _need(tb_):
        tin = tb_ * (res * 2 + att_size * 4 + L * 4)
        tout = tb_ * (3 * L + 1 + nclass_p) * 4
        return weight_bytes + input_buffers * tin + 2 * tout + (2 << 20)

    try:
        cap = int(pltpu.get_tpu_info().vmem_capacity_bytes)
    except Exception:
        cap = 64 * 1024 * 1024                 # conservative (v7x per-TC VMEM)
    budget = int(0.8 * cap)                    # headroom for compiler scratch
    while TB >= 32 and TB % 16 == 0 and _need(TB) > budget:
        TB //= 2
    vmem_limit = int(min(budget, max(_need(TB), 16 << 20)))
    num_tiles = pl.cdiv(B, TB)

    row = lambda i: (i, 0)     # tiled along batch
    const = lambda i: (0, 0)   # VMEM-resident across the whole grid
    W1 = 1                     # single-buffer the constant-index weights

    in_specs = [
        _spec((TB, res), row, input_buffers),        # x (bf16)
        _spec((TB, att_size), row, input_buffers),   # att (f32)
        _spec((TB, L), row, input_buffers),          # noise (f32)
        _spec((res, L), const, W1),                  # W_enc mu half (bf16)
        _spec((1, L), const, W1),                    # b_enc mu half
        _spec((res, L), const, W1),                  # W_enc sigma half (bf16)
        _spec((1, L), const, W1),                    # b_enc sigma half
        _spec((1, L), const, W1),                    # W_dis latent row
        _spec((1, att_size), const, W1),             # W_dis attribute row
        pl.BlockSpec(memory_space=pltpu.MemorySpace.SMEM),  # b_dis scalar
        _spec((L, nclass_p), const, W1),             # W_cls (bf16, padded)
        _spec((1, nclass_p), const, W1),             # b_cls (padded, -1e30)
    ]
    out_specs = (
        _spec((TB, L), row),              # mus
        _spec((TB, L), row),              # stds
        _spec((TB, 1), row),              # dis_out
        _spec((TB, nclass_p), row),       # pred (lane-dense, padded)
        _spec((TB, L), row),              # encoder_out
    )
    out_shape = (
        jax.ShapeDtypeStruct((B, L), jnp.float32),
        jax.ShapeDtypeStruct((B, L), jnp.float32),
        jax.ShapeDtypeStruct((B, 1), jnp.float32),
        jax.ShapeDtypeStruct((B, nclass_p), jnp.float32),
        jax.ShapeDtypeStruct((B, L), jnp.float32),
    )

    flops = int(2 * B * res * 2 * L + 2 * B * L * nclass_p
                + 2 * B * (L + att_size) + 8 * B * L)
    transcendentals = int(2 * B * L + B * nclass_p)
    bytes_accessed = int(B * (res * 2 + att_size * 4 + L * 4)
                         + weight_bytes + 4
                         + B * (3 * L + 1 + nclass_p) * 4)

    kernel = functools.partial(mapping_kernel, train_G=train_G)
    mus, stds, dis_out, pred_p, enc_out = pl.pallas_call(
        kernel,
        out_shape=out_shape,
        grid_spec=pltpu.PrefetchScalarGridSpec(
            num_scalar_prefetch=0,
            grid=(num_tiles,),
            in_specs=in_specs,
            out_specs=out_specs,
        ),
        compiler_params=pltpu.CompilerParams(
            dimension_semantics=("parallel",),
            vmem_limit_bytes=vmem_limit,
        ),
        cost_estimate=pl.CostEstimate(
            flops=flops,
            transcendentals=transcendentals,
            bytes_accessed=bytes_accessed,
        ),
    )(x_bf, att, noise, w_mu, b_mu, w_sg, b_sg,
      w_dis_enc, w_dis_att, b_dis, w_cls_p, b_cls_p)

    return mus, stds, dis_out, pred_p[:, :nclass], enc_out


def init_params(key, res_size, att_size, laten_size, nclass_seen):
    """weights_init: Linear.weight ~ N(0, 0.02), Linear.bias = 0.

    Weights are stored transposed vs PyTorch ((in, out)); the discriminator
    weight is split into latent / attribute rows so the concat never exists.
    """
    k1, k2, k3 = jax.random.split(key, 3)
    w_enc = 0.02 * jax.random.normal(k1, (res_size, 2 * laten_size), jnp.float32)
    b_enc = jnp.zeros((1, 2 * laten_size), jnp.float32)
    w_dis = 0.02 * jax.random.normal(k2, (1, laten_size + att_size), jnp.float32)
    w_dis_enc = w_dis[:, :laten_size]
    w_dis_att = w_dis[:, laten_size:]
    b_dis = jnp.zeros((1, 1), jnp.float32)
    w_cls = 0.02 * jax.random.normal(k3, (laten_size, nclass_seen), jnp.float32)
    b_cls = jnp.zeros((1, nclass_seen), jnp.float32)
    return (w_enc, b_enc, w_dis_enc, w_dis_att, b_dis, w_cls, b_cls)


if __name__ == "__main__":
    # Small shapes consistent with the module (opt.resSize, opt.attSize,
    # opt.latenSize, opt.nclass_seen).
    B, RES, ATT, LATEN, NCLS = 2, 16, 8, 32, 10

    key = jax.random.PRNGKey(0)
    kx, ka, kn, kp = jax.random.split(key, 4)
    x = jax.random.normal(kx, (B, RES), jnp.float32)
    att = jax.random.normal(ka, (B, ATT), jnp.float32)
    noise = jax.random.normal(kn, (B, LATEN), jnp.float32)   # torch.randn_like
    params = init_params(kp, RES, ATT, LATEN, NCLS)

    outs = jax.block_until_ready(mapping_forward(x, att, noise, params))
    mus, stds, dis_out, pred, enc_out = outs

    # Pure-JAX reference of the same math (mirrors the kernel's bf16 MXU casts).
    w_enc, b_enc, w_de, w_da, b_dis, w_cls, b_cls = params
    z = jnp.dot(x.astype(jnp.bfloat16), w_enc.astype(jnp.bfloat16),
                preferred_element_type=jnp.float32) + b_enc
    laten = jnp.where(z > 0, z, 0.2 * z)
    mus_r = laten[:, :LATEN]
    stds_r = 1.0 / (1.0 + jnp.exp(-laten[:, LATEN:]))
    enc_r = noise * stds_r + mus_r
    dis_r = (jnp.sum(enc_r * w_de, axis=-1, keepdims=True)
             + jnp.sum(att * w_da, axis=-1, keepdims=True) + b_dis)
    logits_r = jnp.dot(mus_r.astype(jnp.bfloat16), w_cls.astype(jnp.bfloat16),
                       preferred_element_type=jnp.float32) + b_cls
    m_r = jnp.max(logits_r, axis=-1, keepdims=True)
    s_r = logits_r - m_r
    pred_r = s_r - jnp.log(jnp.sum(jnp.exp(s_r), axis=-1, keepdims=True))

    refs = (mus_r, stds_r, dis_r, pred_r, enc_r)
    names = ("mus", "stds", "dis_out", "pred", "encoder_out")
    for name, got, want in zip(names, outs, refs):
        assert got.shape == want.shape, (name, got.shape, want.shape)
        assert jnp.allclose(got, want, atol=2e-2, rtol=2e-2), name

    # train_G=True branch: discriminator consumes mus instead of encoder_out.
    outs_g = jax.block_until_ready(
        mapping_forward(x, att, noise, params, train_G=True))
    dis_g_ref = (jnp.sum(mus_r * w_de, axis=-1, keepdims=True)
                 + jnp.sum(att * w_da, axis=-1, keepdims=True) + b_dis)
    assert jnp.allclose(outs_g[2], dis_g_ref, atol=2e-2, rtol=2e-2), "dis_train_G"

    print("KERNEL_OK")
</pallas_src>

<mosaic_0001>
module attributes {stable_mosaic.version = 11 : i64} {
  func.func @mapping_kernel(%arg0: i32, %arg1: memref<2x16xbf16, #tpu.memory_space<vmem>>, %arg2: memref<2x8xf32, #tpu.memory_space<vmem>>, %arg3: memref<2x32xf32, #tpu.memory_space<vmem>>, %arg4: memref<16x32xbf16, #tpu.memory_space<vmem>>, %arg5: memref<1x32xf32, #tpu.memory_space<vmem>>, %arg6: memref<16x32xbf16, #tpu.memory_space<vmem>>, %arg7: memref<1x32xf32, #tpu.memory_space<vmem>>, %arg8: memref<1x32xf32, #tpu.memory_space<vmem>>, %arg9: memref<1x8xf32, #tpu.memory_space<vmem>>, %arg10: memref<1x1xf32, #tpu.memory_space<smem>>, %arg11: memref<32x128xbf16, #tpu.memory_space<vmem>>, %arg12: memref<1x128xf32, #tpu.memory_space<vmem>>, %arg13: memref<2x32xf32, #tpu.memory_space<vmem>>, %arg14: memref<2x32xf32, #tpu.memory_space<vmem>>, %arg15: memref<2x1xf32, #tpu.memory_space<vmem>>, %arg16: memref<2x128xf32, #tpu.memory_space<vmem>>, %arg17: memref<2x32xf32, #tpu.memory_space<vmem>>) attributes {dimension_semantics = [#tpu.dimension_semantics<parallel>], iteration_bounds = array<i64: 1>, scalar_prefetch = 0 : i64, scratch_operands = 0 : i64, tpu.core_type = #tpu.core_type<tc>, window_params = [{pipeline_mode = #tpu.pipeline_mode<double_buffered>, transform_indices = @transform_0, window_bounds = array<i64: 2, 16>}, {pipeline_mode = #tpu.pipeline_mode<double_buffered>, transform_indices = @transform_1, window_bounds = array<i64: 2, 8>}, {pipeline_mode = #tpu.pipeline_mode<double_buffered>, transform_indices = @transform_2, window_bounds = array<i64: 2, 32>}, {pipeline_mode = #tpu.pipeline_mode<synchronous>, transform_indices = @transform_3, window_bounds = array<i64: 16, 32>}, {pipeline_mode = #tpu.pipeline_mode<synchronous>, transform_indices = @transform_4, window_bounds = array<i64: 1, 32>}, {pipeline_mode = #tpu.pipeline_mode<synchronous>, transform_indices = @transform_5, window_bounds = array<i64: 16, 32>}, {pipeline_mode = #tpu.pipeline_mode<synchronous>, transform_indices = @transform_6, window_bounds = array<i64: 1, 32>}, {pipeline_mode = #tpu.pipeline_mode<synchronous>, transform_indices = @transform_7, window_bounds = array<i64: 1, 32>}, {pipeline_mode = #tpu.pipeline_mode<synchronous>, transform_indices = @transform_8, window_bounds = array<i64: 1, 8>}, {transform_indices = @transform_9, window_bounds = array<i64: 1, 1>}, {pipeline_mode = #tpu.pipeline_mode<synchronous>, transform_indices = @transform_10, window_bounds = array<i64: 32, 128>}, {pipeline_mode = #tpu.pipeline_mode<synchronous>, transform_indices = @transform_11, window_bounds = array<i64: 1, 128>}, {transform_indices = @transform_12, window_bounds = array<i64: 2, 32>}, {transform_indices = @transform_13, window_bounds = array<i64: 2, 32>}, {transform_indices = @transform_14, window_bounds = array<i64: 2, 1>}, {transform_indices = @transform_15, window_bounds = array<i64: 2, 128>}, {transform_indices = @transform_16, window_bounds = array<i64: 2, 32>}]} {
    %c0 = arith.constant 0 : index
    %c0_0 = arith.constant 0 : index
    %0 = vector.load %arg1[%c0, %c0_0] : memref<2x16xbf16, #tpu.memory_space<vmem>>, vector<2x16xbf16>
    %c0_1 = arith.constant 0 : index
    %c0_2 = arith.constant 0 : index
    %1 = vector.load %arg4[%c0_1, %c0_2] : memref<16x32xbf16, #tpu.memory_space<vmem>>, vector<16x32xbf16>
    %cst = arith.constant dense<0.000000e+00> : vector<2x32xf32>
    %2 = tpu.matmul %0, %1, %cst {dimension_numbers = #tpu.dot_dimension_numbers<[1], [0], [0], [1], [0, 0, 1, 1], [], []>} : vector<2x16xbf16>, vector<16x32xbf16>, vector<2x32xf32> -> vector<2x32xf32>
    %c0_3 = arith.constant 0 : index
    %c0_4 = arith.constant 0 : index
    %3 = vector.load %arg5[%c0_3, %c0_4] : memref<1x32xf32, #tpu.memory_space<vmem>>, vector<1x32xf32>
    %4 = vector.broadcast %3 : vector<1x32xf32> to vector<2x32xf32>
    %5 = arith.addf %2, %4 : vector<2x32xf32>
    %c0_5 = arith.constant 0 : index
    %c0_6 = arith.constant 0 : index
    %6 = vector.load %arg6[%c0_5, %c0_6] : memref<16x32xbf16, #tpu.memory_space<vmem>>, vector<16x32xbf16>
    %cst_7 = arith.constant dense<0.000000e+00> : vector<2x32xf32>
    %7 = tpu.matmul %0, %6, %cst_7 {dimension_numbers = #tpu.dot_dimension_numbers<[1], [0], [0], [1], [0, 0, 1, 1], [], []>} : vector<2x16xbf16>, vector<16x32xbf16>, vector<2x32xf32> -> vector<2x32xf32>
    %c0_8 = arith.constant 0 : index
    %c0_9 = arith.constant 0 : index
    %8 = vector.load %arg7[%c0_8, %c0_9] : memref<1x32xf32, #tpu.memory_space<vmem>>, vector<1x32xf32>
    %9 = vector.broadcast %8 : vector<1x32xf32> to vector<2x32xf32>
    %10 = arith.addf %7, %9 : vector<2x32xf32>
    %cst_10 = arith.constant 0.000000e+00 : f32
    %11 = vector.broadcast %cst_10 : f32 to vector<2x32xf32>
    %12 = arith.cmpf ogt, %5, %11 : vector<2x32xf32>
    %cst_11 = arith.constant 2.000000e-01 : f32
    %13 = vector.broadcast %cst_11 : f32 to vector<2x32xf32>
    %14 = arith.mulf %13, %5 : vector<2x32xf32>
    %15 = arith.select %12, %5, %14 : vector<2x32xi1>, vector<2x32xf32>
    %cst_12 = arith.constant 0.000000e+00 : f32
    %16 = vector.broadcast %cst_12 : f32 to vector<2x32xf32>
    %17 = arith.cmpf ogt, %10, %16 : vector<2x32xf32>
    %cst_13 = arith.constant 2.000000e-01 : f32
    %18 = vector.broadcast %cst_13 : f32 to vector<2x32xf32>
    %19 = arith.mulf %18, %10 : vector<2x32xf32>
    %20 = arith.select %17, %10, %19 : vector<2x32xi1>, vector<2x32xf32>
    %cst_14 = arith.constant 0.000000e+00 : f32
    %21 = vector.broadcast %cst_14 : f32 to vector<2x32xf32>
    %22 = arith.subf %21, %20 : vector<2x32xf32>
    %23 = math.exp %22 : vector<2x32xf32>
    %cst_15 = arith.constant 1.000000e+00 : f32
    %24 = vector.broadcast %cst_15 : f32 to vector<2x32xf32>
    %25 = arith.addf %24, %23 : vector<2x32xf32>
    %26 = tpu.reciprocal %25 {approx = true} : vector<2x32xf32> -> vector<2x32xf32>
    %c0_16 = arith.constant 0 : index
    %c0_17 = arith.constant 0 : index
    %27 = vector.load %arg3[%c0_16, %c0_17] : memref<2x32xf32, #tpu.memory_space<vmem>>, vector<2x32xf32>
    %28 = arith.mulf %27, %26 : vector<2x32xf32>
    %29 = arith.addf %28, %15 : vector<2x32xf32>
    %c0_18 = arith.constant 0 : index
    %c0_19 = arith.constant 0 : index
    %30 = vector.load %arg8[%c0_18, %c0_19] : memref<1x32xf32, #tpu.memory_space<vmem>>, vector<1x32xf32>
    %31 = vector.broadcast %30 : vector<1x32xf32> to vector<2x32xf32>
    %32 = arith.mulf %29, %31 : vector<2x32xf32>
    %cst_20 = arith.constant dense<0.000000e+00> : vector<2xf32>
    %33 = vector.multi_reduction <add>, %32, %cst_20 [1] : vector<2x32xf32> to vector<2xf32>
    %34 = vector.shape_cast %33 : vector<2xf32> to vector<2x1xf32>
    %c0_21 = arith.constant 0 : index
    %c0_22 = arith.constant 0 : index
    %35 = vector.load %arg2[%c0_21, %c0_22] : memref<2x8xf32, #tpu.memory_space<vmem>>, vector<2x8xf32>
    %c0_23 = arith.constant 0 : index
    %c0_24 = arith.constant 0 : index
    %36 = vector.load %arg9[%c0_23, %c0_24] : memref<1x8xf32, #tpu.memory_space<vmem>>, vector<1x8xf32>
    %37 = vector.broadcast %36 : vector<1x8xf32> to vector<2x8xf32>
    %38 = arith.mulf %35, %37 : vector<2x8xf32>
    %cst_25 = arith.constant dense<0.000000e+00> : vector<2xf32>
    %39 = vector.multi_reduction <add>, %38, %cst_25 [1] : vector<2x8xf32> to vector<2xf32>
    %40 = vector.shape_cast %39 : vector<2xf32> to vector<2x1xf32>
    %41 = arith.addf %34, %40 : vector<2x1xf32>
    %c0_26 = arith.constant 0 : index
    %c0_27 = arith.constant 0 : index
    %42 = memref.load %arg10[%c0_26, %c0_27] : memref<1x1xf32, #tpu.memory_space<smem>>
    %43 = vector.broadcast %42 : f32 to vector<2x1xf32>
    %44 = arith.addf %41, %43 : vector<2x1xf32>
    %45 = arith.truncf %15 : vector<2x32xf32> to vector<2x32xbf16>
    %c0_28 = arith.constant 0 : index
    %c0_29 = arith.constant 0 : index
    %46 = vector.load %arg11[%c0_28, %c0_29] : memref<32x128xbf16, #tpu.memory_space<vmem>>, vector<32x128xbf16>
    %cst_30 = arith.constant dense<0.000000e+00> : vector<2x128xf32>
    %47 = tpu.matmul %45, %46, %cst_30 {dimension_numbers = #tpu.dot_dimension_numbers<[1], [0], [0], [1], [0, 0, 1, 1], [], []>} : vector<2x32xbf16>, vector<32x128xbf16>, vector<2x128xf32> -> vector<2x128xf32>
    %c0_31 = arith.constant 0 : index
    %c0_32 = arith.constant 0 : index
    %48 = vector.load %arg12[%c0_31, %c0_32] : memref<1x128xf32, #tpu.memory_space<vmem>>, vector<1x128xf32>
    %49 = vector.broadcast %48 : vector<1x128xf32> to vector<2x128xf32>
    %50 = arith.addf %47, %49 : vector<2x128xf32>
    %cst_33 = arith.constant dense<0xFF800000> : vector<2xf32>
    %51 = vector.multi_reduction <maximumf>, %50, %cst_33 [1] : vector<2x128xf32> to vector<2xf32>
    %52 = vector.shape_cast %51 : vector<2xf32> to vector<2x1xf32>
    %53 = vector.broadcast %52 : vector<2x1xf32> to vector<2x128xf32>
    %54 = arith.subf %50, %53 : vector<2x128xf32>
    %55 = math.exp %54 : vector<2x128xf32>
    %cst_34 = arith.constant dense<0.000000e+00> : vector<2xf32>
    %56 = vector.multi_reduction <add>, %55, %cst_34 [1] : vector<2x128xf32> to vector<2xf32>
    %57 = vector.shape_cast %56 : vector<2xf32> to vector<2x1xf32>
    %58 = math.log %57 : vector<2x1xf32>
    %59 = vector.broadcast %58 : vector<2x1xf32> to vector<2x128xf32>
    %60 = arith.subf %54, %59 : vector<2x128xf32>
    %c0_35 = arith.constant 0 : index
    %c0_36 = arith.constant 0 : index
    %61 = vector.load %arg13[%c0_35, %c0_36] : memref<2x32xf32, #tpu.memory_space<vmem>>, vector<2x32xf32>
    tpu.vector_store %arg13[%c0_35, %c0_36], %15 {strides = array<i32>} : memref<2x32xf32, #tpu.memory_space<vmem>>, vector<2x32xf32>,
    %c0_37 = arith.constant 0 : index
    %c0_38 = arith.constant 0 : index
    %62 = vector.load %arg14[%c0_37, %c0_38] : memref<2x32xf32, #tpu.memory_space<vmem>>, vector<2x32xf32>
    tpu.vector_store %arg14[%c0_37, %c0_38], %26 {strides = array<i32>} : memref<2x32xf32, #tpu.memory_space<vmem>>, vector<2x32xf32>,
    %c0_39 = arith.constant 0 : index
    %c0_40 = arith.constant 0 : index
    %63 = vector.load %arg15[%c0_39, %c0_40] : memref<2x1xf32, #tpu.memory_space<vmem>>, vector<2x1xf32>
    tpu.vector_store %arg15[%c0_39, %c0_40], %44 {strides = array<i32>} : memref<2x1xf32, #tpu.memory_space<vmem>>, vector<2x1xf32>,
    %c0_41 = arith.constant 0 : index
    %c0_42 = arith.constant 0 : index
    %64 = vector.load %arg16[%c0_41, %c0_42] : memref<2x128xf32, #tpu.memory_space<vmem>>, vector<2x128xf32>
    tpu.vector_store %arg16[%c0_41, %c0_42], %60 {strides = array<i32>} : memref<2x128xf32, #tpu.memory_space<vmem>>, vector<2x128xf32>,
    %c0_43 = arith.constant 0 : index
    %c0_44 = arith.constant 0 : index
    %65 = vector.load %arg17[%c0_43, %c0_44] : memref<2x32xf32, #tpu.memory_space<vmem>>, vector<2x32xf32>
    tpu.vector_store %arg17[%c0_43, %c0_44], %29 {strides = array<i32>} : memref<2x32xf32, #tpu.memory_space<vmem>>, vector<2x32xf32>,
    return
  }
  func.func @transform_0(%arg0: i32) -> (i32, i32) {
    %c0_i32 = arith.constant 0 : i32
    %c0_i32_0 = arith.constant 0 : i32
    return %arg0, %c0_i32 : i32, i32
  }
  func.func @transform_1(%arg0: i32) -> (i32, i32) {
    %c0_i32 = arith.constant 0 : i32
    %c0_i32_0 = arith.constant 0 : i32
    return %arg0, %c0_i32 : i32, i32
  }
  func.func @transform_2(%arg0: i32) -> (i32, i32) {
    %c0_i32 = arith.constant 0 : i32
    %c0_i32_0 = arith.constant 0 : i32
    return %arg0, %c0_i32 : i32, i32
  }
  func.func @transform_3(%arg0: i32) -> (i32, i32) {
    %c0_i32 = arith.constant 0 : i32
    %c0_i32_0 = arith.constant 0 : i32
    %c0_i32_1 = arith.constant 0 : i32
    return %c0_i32, %c0_i32_0 : i32, i32
  }
  func.func @transform_4(%arg0: i32) -> (i32, i32) {
    %c0_i32 = arith.constant 0 : i32
    %c0_i32_0 = arith.constant 0 : i32
    %c0_i32_1 = arith.constant 0 : i32
    return %c0_i32, %c0_i32_0 : i32, i32
  }
  func.func @transform_5(%arg0: i32) -> (i32, i32) {
    %c0_i32 = arith.constant 0 : i32
    %c0_i32_0 = arith.constant 0 : i32
    %c0_i32_1 = arith.constant 0 : i32
    return %c0_i32, %c0_i32_0 : i32, i32
  }
  func.func @transform_6(%arg0: i32) -> (i32, i32) {
    %c0_i32 = arith.constant 0 : i32
    %c0_i32_0 = arith.constant 0 : i32
    %c0_i32_1 = arith.constant 0 : i32
    return %c0_i32, %c0_i32_0 : i32, i32
  }
  func.func @transform_7(%arg0: i32) -> (i32, i32) {
    %c0_i32 = arith.constant 0 : i32
    %c0_i32_0 = arith.constant 0 : i32
    %c0_i32_1 = arith.constant 0 : i32
    return %c0_i32, %c0_i32_0 : i32, i32
  }
  func.func @transform_8(%arg0: i32) -> (i32, i32) {
    %c0_i32 = arith.constant 0 : i32
    %c0_i32_0 = arith.constant 0 : i32
    %c0_i32_1 = arith.constant 0 : i32
    return %c0_i32, %c0_i32_0 : i32, i32
  }
  func.func @transform_9(%arg0: i32) -> (i32, i32) {
    %c0_i32 = arith.constant 0 : i32
    %c0_i32_0 = arith.constant 0 : i32
    %c0_i32_1 = arith.constant 0 : i32
    return %c0_i32, %c0_i32_0 : i32, i32
  }
  func.func @transform_10(%arg0: i32) -> (i32, i32) {
    %c0_i32 = arith.constant 0 : i32
    %c0_i32_0 = arith.constant 0 : i32
    %c0_i32_1 = arith.constant 0 : i32
    return %c0_i32, %c0_i32_0 : i32, i32
  }
  func.func @transform_11(%arg0: i32) -> (i32, i32) {
    %c0_i32 = arith.constant 0 : i32
    %c0_i32_0 = arith.constant 0 : i32
    %c0_i32_1 = arith.constant 0 : i32
    return %c0_i32, %c0_i32_0 : i32, i32
  }
  func.func @transform_12(%arg0: i32) -> (i32, i32) {
    %c0_i32 = arith.constant 0 : i32
    %c0_i32_0 = arith.constant 0 : i32
    return %arg0, %c0_i32 : i32, i32
  }
  func.func @transform_13(%arg0: i32) -> (i32, i32) {
    %c0_i32 = arith.constant 0 : i32
    %c0_i32_0 = arith.constant 0 : i32
    return %arg0, %c0_i32 : i32, i32
  }
  func.func @transform_14(%arg0: i32) -> (i32, i32) {
    %c0_i32 = arith.constant 0 : i32
    %c0_i32_0 = arith.constant 0 : i32
    return %arg0, %c0_i32 : i32, i32
  }
  func.func @transform_15(%arg0: i32) -> (i32, i32) {
    %c0_i32 = arith.constant 0 : i32
    %c0_i32_0 = arith.constant 0 : i32
    return %arg0, %c0_i32 : i32, i32
  }
  func.func @transform_16(%arg0: i32) -> (i32, i32) {
    %c0_i32 = arith.constant 0 : i32
    %c0_i32_0 = arith.constant 0 : i32
    return %arg0, %c0_i32 : i32, i32
  }
}

</mosaic_0001>

<bundles_post_ra>
// kernel: tpu_custom_call.1
= control target key start
LH: loop header
LB: loop body
LE: loop exit
PB: predicated region body
PF: predicated region fallthrough
CT: control target
= control target key end

     0   :  { %s844_s0 = inlined_call_operand.vmem [shape: bf16[2,16], index: 0, kind: input, shape index: {}]   ;;  %s845_s1 = inlined_call_operand.vmem [shape: f32[2,8], index: 1, kind: input, shape index: {}]   ;;  %s846_s2 = inlined_call_operand.vmem [shape: f32[2,32], index: 2, kind: input, shape index: {}]   ;;  %s847_s3 = inlined_call_operand.vmem [shape: bf16[16,32], index: 3, kind: input, shape index: {}]   ;;  %s848_s4 = inlined_call_operand.vmem [shape: f32[1,32], index: 4, kind: input, shape index: {}]   ;;  %s849_s5 = inlined_call_operand.hbm [shape: bf16[16,32], index: 5, kind: input, shape index: {}]   ;;  %s850_s6 = inlined_call_operand.hbm [shape: f32[1,32], index: 6, kind: input, shape index: {}]   ;;  %s851_s7 = inlined_call_operand.hbm [shape: f32[1,32], index: 7, kind: input, shape index: {}]   ;;  %s852_s8 = inlined_call_operand.vmem [shape: f32[1,8], index: 8, kind: input, shape index: {}]   ;;  %s853_s9 = inlined_call_operand.<no memory space> [shape: f32[1,1], index: 9, kind: input, shape index: {}]   ;;  %s854_s10 = inlined_call_operand.vmem [shape: bf16[32,128], index: 10, kind: input, shape index: {}]   ;;  %s855_s11 = inlined_call_operand.vmem [shape: f32[1,128], index: 11, kind: input, shape index: {}]   ;;  %s856_s12 = inlined_call_operand.hbm [shape: f32[2,32], index: 12, kind: output, shape index: {0}]   ;;  %s857_s13 = inlined_call_operand.hbm [shape: f32[2,32], index: 13, kind: output, shape index: {1}]   ;;  %s858_s14 = inlined_call_operand.vmem [shape: f32[2,1], index: 14, kind: output, shape index: {2}]   ;;  %s859_s15 = inlined_call_operand.hbm [shape: f32[2,128], index: 15, kind: output, shape index: {3}]   ;;  %s860_s16 = inlined_call_operand.hbm [shape: f32[2,32], index: 16, kind: output, shape index: {4}]  }
   0x1   :  { %861 = sst [smem:[#allocation20_spill]] %s844_s0 }
   0x2   :  { %23 = vsyncpa [#allocation4], 0 }
   0x3   :  { %24 = vsyncpa [#allocation7], 0 }
   0x4   :  { %25 = vsyncpa [#allocation5], 0 }
   0x5   :  { %26 = vsyncpa [#allocation11], 0 }
   0x6   :  { %27 = vsyncpa [#allocation14], 0  ;;  %s620_s21 = smov [#allocation6]   ;;  %s621_s23 = smov [#allocation3]  }
   0x7   :  { %s56_s22 = sshll.u32 %s620_s21, 4  ;;  %s43_s24 = sshll.u32 %s621_s23, 4  ;;  %s57_s22 = int_to_ptr.vmem [resolvable:$true] %s56_s22  ;;  %s716_s24 = int_to_ptr.vmem [resolvable:$true] %s43_s24 }
   0x8   :  { %s456_s27 = scalar_lea.hbm %s850_s6, 16 }
   0x9   :  { %p457_p0 = scmp.ne.s32.totalorder %s850_s6, %s456_s27  ;;  %p460_p1 = scmp.lt.u32.totalorder %s456_s27, %s850_s6 }
   0xb   :  { %p462_p2 = pnand %p460_p1, %p457_p0 }
   0xd   :  { %465 = shalt.err (!%p462_p2)
}
   0xe   :  { %s466_s17 = scalar_lea.vmem %s57_s22, 16  ;;  %s470_s18 = scalar_lea.vmem %s57_s22, 32 }
   0xf   :  { %p467_p3 = scmp.ne.s32.totalorder %s57_s22, %s466_s17  ;;  %p471_p4 = scmp.lt.s32.totalorder %s57_s22, %s57_s22 }
  0x10   :  { %p472_p5 = scmp.lt.s32.totalorder %s470_s18, %s466_s17 }
  0x12   :  { %p473_p6 = por %p472_p5, %p471_p4 }
  0x14   :  { %p474_p7 = pnand %p473_p6, %p467_p3 }
  0x16   :  { %477 = shalt.err (!%p474_p7)
}
  0x17   :  { %59 = dma.hbm_to_vmem [thread:$0]  %s850_s6, 16, %s57_s22, [#allocation7]  }
  0x18   :  { %s478_s25 = scalar_lea.hbm %s849_s5, 128 }
  0x19   :  { %p479_p8 = scmp.ne.s32.totalorder %s849_s5, %s478_s25  ;;  %p482_p9 = scmp.lt.u32.totalorder %s478_s25, %s849_s5 }
  0x1b   :  { %p484_p10 = pnand %p482_p9, %p479_p8 }
  0x1d   :  { %487 = shalt.err (!%p484_p10)
}
  0x1e   :  { %s488_s30 = scalar_lea.vmem %s716_s24, 128  ;;  %p493_p12 = scmp.lt.s32.totalorder %s716_s24, %s716_s24 }
  0x1f   :  { %p489_p11 = scmp.ne.s32.totalorder %s716_s24, %s488_s30  ;;  %p494_p13 = scmp.lt.s32.totalorder %s488_s30, %s488_s30 }
  0x21   :  { %p495_p0 = por %p494_p13, %p493_p12 }
  0x23   :  { %p496_p1 = pnand %p495_p0, %p489_p11 }
  0x25   :  { %499 = shalt.err (!%p496_p1)
}
  0x26   :  { %s622_s6 = smov 64   ;;  %s623_s22 = smov 4  }
  0x27   :  { %49 = dma.hbm_to_vmem [thread:$0]  %s849_s5, 128, %s716_s24, [#allocation4], %s622_s6, %s622_s6, %s623_s22  }
  0x28   :  { %s624_s18 = smov [#allocation8]   ;;  %s500_s23 = scalar_lea.hbm %s851_s7, 16 }
  0x29   :  { %s66_s19 = sshll.u32 %s624_s18, 4  ;;  %p501_p2 = scmp.ne.s32.totalorder %s851_s7, %s500_s23  ;;  %s67_s19 = int_to_ptr.vmem [resolvable:$true] %s66_s19 }
  0x2a   :  { %p504_p3 = scmp.lt.u32.totalorder %s500_s23, %s851_s7 }
  0x2c   :  { %p506_p4 = pnand %p504_p3, %p501_p2 }
  0x2e   :  { %509 = shalt.err (!%p506_p4)
}
  0x2f   :  { %s510_s29 = scalar_lea.vmem %s67_s19, 16  ;;  %s514_s5 = scalar_lea.vmem %s67_s19, 32 }
  0x30   :  { %p511_p5 = scmp.ne.s32.totalorder %s67_s19, %s510_s29  ;;  %p515_p6 = scmp.lt.s32.totalorder %s67_s19, %s67_s19 }
  0x31   :  { %p516_p7 = scmp.lt.s32.totalorder %s514_s5, %s510_s29 }
  0x33   :  { %p517_p8 = por %p516_p7, %p515_p6 }
  0x35   :  { %p518_p9 = pnand %p517_p8, %p511_p5 }
  0x37   :  { %521 = shalt.err (!%p518_p9)
}
  0x38   :  { %69 = dma.hbm_to_vmem [thread:$0]  %s851_s7, 16, %s67_s19, [#allocation7]  }
  0x39   :  { %610 = dma.done.wait [#allocation4], 128  }
  0x3a   :  { %611 = vsyncadd [#allocation4], 4294967168 }
  0x3b   :  { %612 = dma.done.wait [#allocation7], 32  }
  0x3c   :  { %613 = vsyncadd [#allocation7], 4294967264  ;;  %v625_v0 = vmov 0.0   ;;  %vm626_vm0 = vmmov 0   ;;  %v444_v1 = vld [vmem:[%s847_s3] sm:$0xff]   ;;  %s862_s18 = sld [smem:[#allocation20_spill]]  ;;  %v244_v39 = vstv %s853_s9 }
  0x3d   :  { %413 = vmatprep.subr.bf16.mxu0 %v625_v0  ;;  %419 = vmatprep.subr.bf16.mxu1 %v625_v0  ;;  %v445_v2 = vld [vmem:[#allocation3] sm:$0xff]   ;;  %vm104_vm1 = vcmask 130048   ;;  %v447_v5 = vld [vmem:[%s854_s10 + $0x8] sm:$0xff]   ;;  %vm225_vm3 = vcmask 254976   ;;  %vm270_vm5 = vcmask 261120   ;;  %vm238_vm6 = vcmask 58368  }
  0x3e   :  { %415 = vmatprep.mubr.msk.bf16.mxu0 %vm626_vm0, %v625_v0  ;;  %421 = vmatprep.mubr.msk.bf16.mxu1 %vm626_vm0, %v625_v0  ;;  %v446_v4 = vld [vmem:[%s854_s10] sm:$0xff]   ;;  %v397_v7 = vld [vmem:[#allocation6] ss:$0 sm:$0xff]  ;;  %v400_v30 = vld [vmem:[#allocation8] ss:$0 sm:$0xff]  ;;  %vm329_vm7 = vcmask 1024  }
  0x3f   :  { %414 = vmatpush3.bf16.msra.mxu0 %v444_v1  ;;  %420 = vmatpush3.bf16.msra.mxu1 %v445_v2  ;;  %v394_v6 = vld [vmem:[%s848_s4] ss:$0 sm:$0xff]  ;;  %vm314_vm8 = vcmask 1041408   ;;  %s627_s9 = smov [#allocation10]   ;;  %s628_s30 = smov [#allocation9]  }
  0x40   :  { %425 = vmatprep.subr.bf16.mxu0 %v625_v0  ;;  %v214_v27 = vld [vmem:[%s846_s2] sm:$0x3] }
  0x41   :  { %v229_v31 = vld [vmem:[%s845_s1] sm:$0x3] }
  0x42   :  { %v88_v3 = vld [vmem:[%s862_s18] sm:$0x1] }
  0x43   :  { %416 = vmatmul.mubr.msk.bf16.vlgmr.msra.gmra.mrb[0].mxu0 %vm104_vm1, %v88_v3  ;;  %422 = vmatmul.mubr.msk.bf16.vlgmr.msra.gmra.mrb[0].mxu1 %vm104_vm1, %v88_v3  ;;  %v401_v32 = vld [vmem:[%s852_s8] ss:$0 sm:$0xff] }
  0x44   :  { %429 = vmatprep.mubr.msk.bf16.mxu0 %vm626_vm0, %v625_v0  ;;  %426 = vmatpush3.bf16.msra.mxu0 %v446_v4  ;;  %v237_v35 = vmul.f32 %v401_v32, %v229_v31  ;;  %v402_v43 = vld [vmem:[%s855_s11] ss:$0 sm:$0xff]  ;;  %s339_s11 = sshll.u32 %s628_s30, 4  ;;  %s340_s11 = int_to_ptr.vmem [resolvable:$true] %s339_s11 }
  0x45   :  { %427 = vmatprep.subr.bf16.mxu0 %v625_v0 }
  0x46   :  { %v239_v37 = vsel %vm238_vm6, %v237_v35, 0.0 }
  0x48   :  { %428 = vmatpush3.bf16.msra.mxu0 %v447_v5 }
 0x116   :  { %v142_v8 = vpop.f32.mrb[0].mxu0  ;;  %v197_v10 = vpop.f32.mrb[0].mxu1 }
 0x117   :  { %v143_v9 = vadd.f32 %v394_v6, %v142_v8  ;;  %v417_v11 = vpop.f32.mrb[1].mxu0  ;;  %v198_v12 = vadd.f32 %v397_v7, %v197_v10  ;;  %v423_v14 = vpop.f32.mrb[1].mxu1 }
 0x118   :  { %v145_v13 = vpop.f32.mrb[2].mxu0  ;;  %v200_v17 = vpop.f32.mrb[2].mxu1 }
 0x119   :  { %vm203_vm2 = vcmp.gt.f32.partialorder %v143_v9, 0.0  ;;  %v204_v15 = vmul.f32 0.2, %v143_v9  ;;  %v418_v16 = vpop.f32.mrb[3].mxu0  ;;  %vm206_vm4 = vcmp.gt.f32.partialorder %v198_v12, 0.0  ;;  %v424_v19 = vpop.f32.mrb[3].mxu1 }
 0x11a   :  { %v207_v18 = vmul.f32 0.2, %v198_v12 }
 0x11b   :  { %v205_v20 = vsel %vm203_vm2, %v143_v9, %v204_v15 }
 0x11c   :  { %v246_v21 = vpack.c.bf16 %v205_v20, %v205_v20  ;;  %v208_v22 = vsel %vm206_vm4, %v198_v12, %v207_v18  ;;  %327 = vst.msk [vmem:[#allocation9] sm:$0x3] %vm225_vm3, %v205_v20 }
 0x11d   :  { %v209_v23 = vsub.f32 0.0, %v208_v22 }
 0x11e   :  { %430 = vmatmul.mubr.msk.bf16.vlgmr.msra.gmra.mrb[4].mxu0 %vm270_vm5, %v246_v21 }
 0x11f   :  { %v210_v24 = vmul.f32 1.442695, %v209_v23 }
 0x121   :  { %448 = vpow2.f32 %v210_v24 }
 0x12b   :  { %v449_v25 = vpop.eup %448 }
 0x12c   :  { %v212_v26 = vadd.f32 1.0, %v449_v25 }
 0x12e   :  { %450 = vrcp.f32 %v212_v26 }
 0x138   :  { %v451_v28 = vpop.eup %450 }
 0x139   :  { %v215_v29 = vmul.f32 %v451_v28, %v214_v27  ;;  %328 = vst.msk [vmem:[#allocation10] sm:$0x3] %vm225_vm3, %v451_v28 }
 0x13b   :  { %v216_v33 = vadd.f32 %v215_v29, %v205_v20 }
 0x13d   :  { %v224_v34 = vmul.f32 %v400_v30, %v216_v33  ;;  %332 = vst.msk [vmem:[#allocation13] sm:$0x3] %vm225_vm3, %v216_v33 }
 0x13f   :  { %v226_v36 = vsel %vm225_vm3, %v224_v34, 0.0 }
 0x140   :  { %227 = vadd.xlane.f32.xlu1 %v226_v36 }
 0x144   :  { %240 = vadd.xlane.f32.xlu1 %v239_v37 }
 0x1cd   :  { %v228_v38 = vpop.xlane.xlu1 %227 }
 0x1d1   :  { %v241_v40 = vpop.xlane.xlu1 %240 }
 0x1d2   :  { %v242_v41 = vadd.f32 %v241_v40, %v228_v38 }
 0x1d4   :  { %v245_v42 = vadd.f32 %v244_v39, %v242_v41 }
 0x1d6   :  { %330 = vst.msk [vmem:[%s858_s14] sm:$0x3] %vm329_vm7, %v245_v42  ;;  %s349_s14 = sshll.u32 %s627_s9, 4  ;;  %s350_s14 = int_to_ptr.vmem [resolvable:$true] %s349_s14 }
 0x1d7   :  { %s522_s6 = scalar_lea.vmem %s350_s14, 32  ;;  %p527_p11 = scmp.lt.s32.totalorder %s350_s14, %s350_s14 }
 0x1d8   :  { %p523_p10 = scmp.ne.s32.totalorder %s350_s14, %s522_s6  ;;  %p528_p12 = scmp.lt.s32.totalorder %s522_s6, %s522_s6 }
 0x1da   :  { %p529_p13 = por %p528_p12, %p527_p11 }
 0x1dc   :  { %p530_p0 = pnand %p529_p13, %p523_p10 }
 0x1f1   :  { %v308_v44 = vpop.f32.mrb[4].mxu0 }
 0x1f2   :  { %v309_v45 = vadd.f32 %v402_v43, %v308_v44  ;;  %v431_v46 = vpop.f32.mrb[5].mxu0 }
 0x1f3   :  { %v311_v47 = vpop.f32.mrb[6].mxu0 }
 0x1f4   :  { %v432_v48 = vpop.f32.mrb[7].mxu0  ;;  %v315_v49 = vsel %vm314_vm8, %v309_v45, -inf }
 0x1f5   :  { %316 = vmax.xlane.f32.xlu0 %v315_v49 }
 0x282   :  { %v317_v50 = vpop.xlane.xlu0 %316 }
 0x283   :  { %v318_v51 = vsub.f32 %v309_v45, %v317_v50 }
 0x285   :  { %v319_v52 = vmul.f32 1.442695, %v318_v51 }
 0x287   :  { %452 = vpow2.f32 %v319_v52 }
 0x291   :  { %v453_v53 = vpop.eup %452 }
 0x292   :  { %v321_v54 = vsel %vm314_vm8, %v453_v53, 0.0 }
 0x293   :  { %322 = vadd.xlane.f32.xlu0 %v321_v54 }
 0x294   :  { %533 = shalt.err (!%p530_p0)
}
 0x295   :  { %s534_s17 = scalar_lea.hbm %s857_s13, 32 }
 0x296   :  { %p535_p1 = scmp.ne.s32.totalorder %s857_s13, %s534_s17  ;;  %p538_p2 = scmp.lt.u32.totalorder %s534_s17, %s857_s13 }
 0x298   :  { %p540_p3 = pnand %p538_p2, %p535_p1 }
 0x29a   :  { %543 = shalt.err (!%p540_p3)
}
 0x29b   :  { %352 = dma.vmem_to_hbm [thread:$0]  %s350_s14, 32, %s857_s13, [#allocation11]  }
 0x29c   :  { %s544_s23 = scalar_lea.vmem %s340_s11, 32  ;;  %p549_p5 = scmp.lt.s32.totalorder %s340_s11, %s340_s11 }
 0x29d   :  { %p545_p4 = scmp.ne.s32.totalorder %s340_s11, %s544_s23  ;;  %p550_p6 = scmp.lt.s32.totalorder %s544_s23, %s544_s23 }
 0x29f   :  { %p551_p7 = por %p550_p6, %p549_p5 }
 0x2a1   :  { %p552_p8 = pnand %p551_p7, %p545_p4 }
 0x2a3   :  { %555 = shalt.err (!%p552_p8)
}
 0x2a4   :  { %s556_s25 = scalar_lea.hbm %s856_s12, 32 }
 0x2a5   :  { %p557_p9 = scmp.ne.s32.totalorder %s856_s12, %s556_s25  ;;  %p560_p10 = scmp.lt.u32.totalorder %s556_s25, %s856_s12 }
 0x2a7   :  { %p562_p11 = pnand %p560_p10, %p557_p9 }
 0x2a9   :  { %565 = shalt.err (!%p562_p11)
}
 0x2aa   :  { %342 = dma.vmem_to_hbm [thread:$0]  %s340_s11, 32, %s856_s12, [#allocation5]  }
 0x2ab   :  { %s629_s1 = smov [#allocation13]  }
 0x2ac   :  { %s371_s8 = sshll.u32 %s629_s1, 4  ;;  %s372_s8 = int_to_ptr.vmem [resolvable:$true] %s371_s8 }
 0x2ad   :  { %s566_s5 = scalar_lea.vmem %s372_s8, 32  ;;  %p571_p13 = scmp.lt.s32.totalorder %s372_s8, %s372_s8 }
 0x2ae   :  { %p567_p12 = scmp.ne.s32.totalorder %s372_s8, %s566_s5  ;;  %p572_p0 = scmp.lt.s32.totalorder %s566_s5, %s566_s5 }
 0x2b0   :  { %p573_p1 = por %p572_p0, %p571_p13 }
 0x2b2   :  { %p574_p2 = pnand %p573_p1, %p567_p12 }
 0x2b4   :  { %577 = shalt.err (!%p574_p2)
}
 0x2b5   :  { %s578_s14 = scalar_lea.hbm %s860_s16, 32 }
 0x2b6   :  { %p579_p3 = scmp.ne.s32.totalorder %s860_s16, %s578_s14  ;;  %p582_p4 = scmp.lt.u32.totalorder %s578_s14, %s860_s16 }
 0x2b8   :  { %p584_p5 = pnand %p582_p4, %p579_p3 }
 0x2ba   :  { %587 = shalt.err (!%p584_p5)
}
 0x2bb   :  { %374 = dma.vmem_to_hbm [thread:$0]  %s372_s8, 32, %s860_s16, [#allocation14]  }
 0x2bc   :  { %s630_s17 = smov [#allocation12]  }
 0x2bd   :  { %s361_s18 = sshll.u32 %s630_s17, 4  ;;  %s362_s18 = int_to_ptr.vmem [resolvable:$true] %s361_s18 }
 0x2be   :  { %s588_s7 = scalar_lea.vmem %s362_s18, 32  ;;  %p593_p7 = scmp.lt.s32.totalorder %s362_s18, %s362_s18 }
 0x2bf   :  { %p589_p6 = scmp.ne.s32.totalorder %s362_s18, %s588_s7  ;;  %p594_p8 = scmp.lt.s32.totalorder %s588_s7, %s588_s7 }
 0x2c1   :  { %p595_p9 = por %p594_p8, %p593_p7 }
 0x2c3   :  { %p596_p10 = pnand %p595_p9, %p589_p6 }
 0x320   :  { %v323_v55 = vpop.xlane.xlu0 %322 }
 0x321   :  { %454 = vlog2.f32 %v323_v55 }
 0x32b   :  { %v455_v56 = vpop.eup %454 }
 0x32c   :  { %v325_v57 = vmul.f32 0.6931472, %v455_v56 }
 0x32e   :  { %v326_v58 = vsub.f32 %v318_v51, %v325_v57 }
 0x330   :  { %331 = vst [vmem:[#allocation12] sm:$0x3] %v326_v58 }
 0x331   :  { %599 = shalt.err (!%p596_p10)
}
 0x332   :  { %s600_s16 = scalar_lea.hbm %s859_s15, 32 }
 0x333   :  { %p601_p11 = scmp.ne.s32.totalorder %s859_s15, %s600_s16  ;;  %p604_p12 = scmp.lt.u32.totalorder %s600_s16, %s859_s15 }
 0x335   :  { %p606_p13 = pnand %p604_p12, %p601_p11 }
 0x337   :  { %609 = shalt.err (!%p606_p13)
}
 0x338   :  { %364 = dma.vmem_to_hbm [thread:$0]  %s362_s18, 32, %s859_s15, [#allocation11]  }
 0x339   :  { %614 = dma.done.wait [#allocation5], 32  }
 0x33a   :  { %615 = vsyncadd [#allocation5], 4294967264 }
 0x33b   :  { %616 = dma.done.wait [#allocation11], 64  }
 0x33c   :  { %617 = vsyncadd [#allocation11], 4294967232 }
 0x33d   :  { %618 = dma.done.wait [#allocation14], 32  }
 0x33e   :  { %619 = vsyncadd [#allocation14], 4294967264 }
 0x33f   :  { %389 = vsyncpa [#allocation4], 1 }
 0x340   :  { %390 = vsyncpa [#allocation7], 1 }
 0x341   :  { %391 = vsyncpa [#allocation5], 1 }
 0x342   :  { %392 = vsyncpa [#allocation11], 1 }
 0x343   :  { %393 = vsyncpa [#allocation14], 1 }

</bundles_post_ra>
